<compile_context>
chip_gen: v5e
topology: v5e:2x2
jax: 0.10.0
libtpu: 0.0.40
codegen_flags: <defaults>
</compile_context>

<pallas_src>
import jax
import jax.numpy as jnp
from jax.experimental import pallas as pl
from jax.experimental.pallas import tpu as pltpu


# ----------------------------------------------------------------------------
# helpers
# ----------------------------------------------------------------------------
def _round_up(x, m):
    return ((x + m - 1) // m) * m


def _vmem_capacity_bytes():
    """Physical VMEM per TensorCore; conservative fallback if query fails."""
    try:
        info = pltpu.get_tpu_info()
        return int(getattr(info, "vmem_capacity_bytes", 128 * 1024 * 1024))
    except Exception:  # not on TPU / API unavailable -> assume v5e/v6e class
        return 128 * 1024 * 1024


def _tile_caps(compute_dtype):
    """Per-generation (TM, TN, TK) caps and scoped-VMEM limit."""
    small_vmem = _vmem_capacity_bytes() <= 96 * 1024 * 1024  # v7x (64 MiB/TC)
    if jnp.dtype(compute_dtype) == jnp.dtype(jnp.bfloat16):
        if small_vmem:
            caps, limit = (512, 512, 1024), 40 << 20     # ~7 MiB footprint
        else:
            caps, limit = (1024, 1024, 1024), 64 << 20   # ~20 MiB footprint
    else:  # f32 MXU inputs
        if small_vmem:
            caps, limit = (512, 512, 512), 40 << 20
        else:
            caps, limit = (512, 512, 1024), 64 << 20     # ~11 MiB footprint
    return caps, limit


def _pick_tile(dim_pad, cap, base):
    """dim_pad is a multiple of `base`.  Prefer a tile that divides dim_pad
    (no extra wrapper-side padding); only fall back to `cap` (and padding)
    if no divisor exists in [cap//2, cap]."""
    cap = max(base, (cap // base) * base)
    if dim_pad <= cap:
        return dim_pad
    t = cap
    floor = max(base, (cap // 2 // base) * base)
    while t >= floor:
        if dim_pad % t == 0:
            return t
        t -= base
    return cap


# ----------------------------------------------------------------------------
# kernels
# ----------------------------------------------------------------------------
def _linear_kernel_acc(x_ref, w_ref, b_ref, o_ref, acc_ref):
    # x_ref:  (TM, TK)  compute_dtype    activation tile
    # w_ref:  (TK, TN)  compute_dtype    weight tile (pre-transposed, MXU layout)
    # b_ref:  (1,  TN)  float32          bias tile
    # o_ref:  (TM, TN)  out dtype        output tile
    # acc_ref:(TM, TN)  float32          accumulator scratch (K is last grid axis)
    k = pl.program_id(2)

    @pl.when(k == 0)
    def _():
        acc_ref[...] = jnp.zeros_like(acc_ref)

    acc_ref[...] += jnp.dot(x_ref[...], w_ref[...],
                            preferred_element_type=jnp.float32)

    @pl.when(k == pl.num_programs(2) - 1)
    def _():
        o_ref[...] = (acc_ref[...] + b_ref[...]).astype(o_ref.dtype)


def _linear_kernel_k1(x_ref, w_ref, b_ref, o_ref):
    # Single-K-block fast path: no accumulator scratch, no zero-init,
    # no read-modify-write, no final copy.
    o_ref[...] = (jnp.dot(x_ref[...], w_ref[...],
                          preferred_element_type=jnp.float32)
                  + b_ref[...]).astype(o_ref.dtype)


# ----------------------------------------------------------------------------
# wrapper
# ----------------------------------------------------------------------------
def linear_classifier_forward(x, weight, bias, *, compute_dtype=jnp.bfloat16,
                              tm=None, tn=None, tk=None):
    """y = x @ weight.T + bias, matching torch.nn.Linear semantics.

    x:      (B, in_features)            float32
    weight: (out_features, in_features) float32  (PyTorch layout)
    bias:   (out_features,)             float32
    returns (B, out_features)           float32

    compute_dtype: MXU input dtype (bf16 default; accumulation is always f32).
    """
    B, in_f = x.shape
    out_f, in_f2 = weight.shape
    assert in_f == in_f2, "weight in_features mismatch"

    (cap_m, cap_n, cap_k), vmem_limit = _tile_caps(compute_dtype)
    if tm is not None:
        cap_m = tm
    if tn is not None:
        cap_n = tn
    if tk is not None:
        cap_k = tk

    # (8, 128)-aligned problem dims.
    M8 = _round_up(B, 8)
    N128 = _round_up(out_f, 128)      # lane-dense output tiles
    K128 = _round_up(in_f, 128)

    TM = _pick_tile(M8, cap_m, 8)
    TN = _pick_tile(N128, cap_n, 128)
    TK = _pick_tile(K128, cap_k, 128)

    # Megacore: guarantee >= 2 parallel blocks when possible (v7x has 2 TCs).
    if (pl.cdiv(M8, TM) == 1) and (pl.cdiv(N128, TN) == 1) and TM >= 16:
        TM = _round_up(TM // 2, 8)

    M_pad = _round_up(M8, TM)
    N_pad = _round_up(N128, TN)
    K_pad = _round_up(K128, TK)

    # One-time (constant-foldable for a persistent parameter) weight
    # transform: transpose to (in, out) MXU-native RHS layout and cast to the
    # compute dtype so HBM weight bytes halve for bf16.
    w_t = weight.T.astype(compute_dtype)
    x_c = x.astype(compute_dtype)

    # Pad only when required (tile picker already tries to avoid this).
    if (M_pad, K_pad) != (B, in_f):
        x_c = jnp.pad(x_c, ((0, M_pad - B), (0, K_pad - in_f)))
    if (K_pad, N_pad) != (in_f, out_f):
        w_t = jnp.pad(w_t, ((0, K_pad - in_f), (0, N_pad - out_f)))
    b_p = bias
    if N_pad != out_f:
        b_p = jnp.pad(bias, (0, N_pad - out_f))
    b_p = b_p.reshape(1, N_pad).astype(jnp.float32)

    grid_m = M_pad // TM
    grid_n = N_pad // TN
    grid_k = K_pad // TK

    # Cost estimate accounting for re-streaming across the tiled grid.
    in_bytes = jnp.dtype(compute_dtype).itemsize
    cost = pl.CostEstimate(
        flops=2 * M_pad * K_pad * N_pad,
        bytes_accessed=(in_bytes * M_pad * K_pad * grid_n      # x read per N tile
                        + in_bytes * K_pad * N_pad * grid_m    # w read per M tile
                        + 4 * M_pad * N_pad                    # output write
                        + 4 * N_pad * grid_m),                 # bias reads
        transcendentals=0,
    )

    if grid_k == 1:
        kernel = _linear_kernel_k1
        grid = (grid_m, grid_n)
        in_specs = [
            pl.BlockSpec((TM, TK), lambda i, j: (i, 0)),   # x
            pl.BlockSpec((TK, TN), lambda i, j: (0, j)),   # weight (in,out)
            pl.BlockSpec((1, TN), lambda i, j: (0, j)),    # bias
        ]
        out_specs = pl.BlockSpec((TM, TN), lambda i, j: (i, j))
        scratch = []
        dims = ("parallel", "parallel")
    else:
        kernel = _linear_kernel_acc
        grid = (grid_m, grid_n, grid_k)                    # K last: reduction
        in_specs = [
            pl.BlockSpec((TM, TK), lambda i, j, k: (i, k)),   # x
            pl.BlockSpec((TK, TN), lambda i, j, k: (k, j)),   # weight (in,out)
            pl.BlockSpec((1, TN), lambda i, j, k: (0, j)),    # bias
        ]
        out_specs = pl.BlockSpec((TM, TN), lambda i, j, k: (i, j))
        scratch = [pltpu.VMEM((TM, TN), jnp.float32)]
        dims = ("parallel", "parallel", "arbitrary")

    out_p = pl.pallas_call(
        kernel,
        out_shape=jax.ShapeDtypeStruct((M_pad, N_pad), x.dtype),
        grid_spec=pltpu.PrefetchScalarGridSpec(
            num_scalar_prefetch=0,
            grid=grid,
            in_specs=in_specs,
            out_specs=out_specs,
            scratch_shapes=scratch,
        ),
        compiler_params=pltpu.CompilerParams(
            dimension_semantics=dims,
            vmem_limit_bytes=vmem_limit,
        ),
        cost_estimate=cost,
    )(x_c, w_t, b_p)

    if (M_pad, N_pad) != (B, out_f):
        out_p = out_p[:B, :out_f]
    return out_p


# ----------------------------------------------------------------------------
# self-test
# ----------------------------------------------------------------------------
if __name__ == "__main__":
    key = jax.random.PRNGKey(0)
    k_x, k_w, k_b = jax.random.split(key, 3)

    B, in_features, out_features = 8, 32, 16

    # Deterministic PyTorch-like init: U(-1/sqrt(in), 1/sqrt(in))
    bound = 1.0 / (in_features ** 0.5)
    x = jax.random.normal(k_x, (B, in_features), dtype=jnp.float32)
    weight = jax.random.uniform(
        k_w, (out_features, in_features), minval=-bound, maxval=bound,
        dtype=jnp.float32)
    bias = jax.random.uniform(
        k_b, (out_features,), minval=-bound, maxval=bound, dtype=jnp.float32)

    y_ref = x @ weight.T + bias

    # Default perf path: bf16 MXU inputs, f32 accumulation (relaxed tolerance).
    y_bf16 = jax.block_until_ready(linear_classifier_forward(x, weight, bias))
    assert y_bf16.shape == (B, out_features)
    assert jnp.allclose(y_bf16, y_ref, atol=3e-2, rtol=3e-2)

    # f32 compute path: tight numerical check against the reference.
    y_f32 = jax.block_until_ready(
        linear_classifier_forward(x, weight, bias, compute_dtype=jnp.float32))
    assert y_f32.shape == (B, out_features)
    assert jnp.allclose(y_f32, y_ref, atol=1e-5, rtol=1e-5)

    print("KERNEL_OK")
</pallas_src>

<mosaic_0001>
module attributes {stable_mosaic.version = 11 : i64} {
  func.func @_linear_kernel_k1(%arg0: i32, %arg1: i32, %arg2: memref<8x128xbf16, #tpu.memory_space<vmem>>, %arg3: memref<128x128xbf16, #tpu.memory_space<vmem>>, %arg4: memref<1x128xf32, #tpu.memory_space<vmem>>, %arg5: memref<8x128xf32, #tpu.memory_space<vmem>>) attributes {dimension_semantics = [#tpu.dimension_semantics<parallel>, #tpu.dimension_semantics<parallel>], iteration_bounds = array<i64: 1, 1>, scalar_prefetch = 0 : i64, scratch_operands = 0 : i64, tpu.core_type = #tpu.core_type<tc>, window_params = [{transform_indices = @transform_0, window_bounds = array<i64: 8, 128>}, {transform_indices = @transform_1, window_bounds = array<i64: 128, 128>}, {transform_indices = @transform_2, window_bounds = array<i64: 1, 128>}, {transform_indices = @transform_3, window_bounds = array<i64: 8, 128>}]} {
    %c0 = arith.constant 0 : index
    %c0_0 = arith.constant 0 : index
    %0 = vector.load %arg2[%c0, %c0_0] : memref<8x128xbf16, #tpu.memory_space<vmem>>, vector<8x128xbf16>
    %c0_1 = arith.constant 0 : index
    %c0_2 = arith.constant 0 : index
    %1 = vector.load %arg3[%c0_1, %c0_2] : memref<128x128xbf16, #tpu.memory_space<vmem>>, vector<128x128xbf16>
    %cst = arith.constant dense<0.000000e+00> : vector<8x128xf32>
    %2 = tpu.matmul %0, %1, %cst {dimension_numbers = #tpu.dot_dimension_numbers<[1], [0], [0], [1], [0, 0, 1, 1], [], []>} : vector<8x128xbf16>, vector<128x128xbf16>, vector<8x128xf32> -> vector<8x128xf32>
    %c0_3 = arith.constant 0 : index
    %c0_4 = arith.constant 0 : index
    %3 = vector.load %arg4[%c0_3, %c0_4] : memref<1x128xf32, #tpu.memory_space<vmem>>, vector<1x128xf32>
    %4 = vector.broadcast %3 : vector<1x128xf32> to vector<8x128xf32>
    %5 = arith.addf %2, %4 : vector<8x128xf32>
    %c0_5 = arith.constant 0 : index
    %c0_6 = arith.constant 0 : index
    %6 = vector.load %arg5[%c0_5, %c0_6] : memref<8x128xf32, #tpu.memory_space<vmem>>, vector<8x128xf32>
    tpu.vector_store %arg5[%c0_5, %c0_6], %5 {strides = array<i32>} : memref<8x128xf32, #tpu.memory_space<vmem>>, vector<8x128xf32>,
    return
  }
  func.func @transform_0(%arg0: i32, %arg1: i32) -> (i32, i32) {
    %c0_i32 = arith.constant 0 : i32
    %c0_i32_0 = arith.constant 0 : i32
    return %arg0, %c0_i32 : i32, i32
  }
  func.func @transform_1(%arg0: i32, %arg1: i32) -> (i32, i32) {
    %c0_i32 = arith.constant 0 : i32
    %c0_i32_0 = arith.constant 0 : i32
    return %c0_i32, %arg1 : i32, i32
  }
  func.func @transform_2(%arg0: i32, %arg1: i32) -> (i32, i32) {
    %c0_i32 = arith.constant 0 : i32
    %c0_i32_0 = arith.constant 0 : i32
    return %c0_i32, %arg1 : i32, i32
  }
  func.func @transform_3(%arg0: i32, %arg1: i32) -> (i32, i32) {
    %c0_i32 = arith.constant 0 : i32
    return %arg0, %arg1 : i32, i32
  }
}

</mosaic_0001>

<bundles_post_ra>
// kernel: tpu_custom_call.1
= control target key start
LH: loop header
LB: loop body
LE: loop exit
PB: predicated region body
PF: predicated region fallthrough
CT: control target
= control target key end

     0   :  { %8 = vsyncpa [#allocation3], 0  ;;  %s307_s0 = inlined_call_operand.hbm [shape: bf16[8,128], index: 0, kind: input, shape index: {}]   ;;  %s308_s1 = inlined_call_operand.hbm [shape: bf16[128,128], index: 1, kind: input, shape index: {}]   ;;  %s309_s2 = inlined_call_operand.vmem [shape: f32[1,128], index: 2, kind: input, shape index: {}]   ;;  %s310_s3 = inlined_call_operand.hbm [shape: f32[8,128], index: 3, kind: output, shape index: {}]  }
   0x1   :  { %9 = vsyncpa [#allocation6], 0 }
   0x2   :  { %10 = vsyncpa [#allocation4], 0  ;;  %s16_s14 = sshll.u32 %s307_s0, 4  ;;  %s270_s15 = smov [#allocation2]   ;;  %s17_s14 = int_to_ptr.hbm [resolvable:$true] %s16_s14 }
   0x3   :  { %s18_s16 = sshll.u32 %s270_s15, 4  ;;  %s26_s19 = sshll.u32 %s308_s1, 4  ;;  %s19_s16 = int_to_ptr.vmem [resolvable:$true] %s18_s16  ;;  %s27_s19 = int_to_ptr.hbm [resolvable:$true] %s26_s19 }
   0x4   :  { %21 = dma.hbm_to_vmem [thread:$0]  %s17_s14, 64, %s19_s16, [#allocation3]  }
   0x5   :  { %s271_s20 = smov [#allocation5]   ;;  %s272_s22 = smov 64  }
   0x6   :  { %s28_s21 = sshll.u32 %s271_s20, 4  ;;  %s273_s23 = smov 4   ;;  %s29_s21 = int_to_ptr.vmem [resolvable:$true] %s28_s21 }
   0x7   :  { %34 = dma.hbm_to_vmem [thread:$0]  %s27_s19, 1024, %s29_s21, [#allocation6], %s272_s22, %s272_s22, %s273_s23  }
   0x8   :  { %264 = dma.done.wait [#allocation3], 64  }
   0x9   :  { %265 = vsyncadd [#allocation3], 4294967232 }
   0xa   :  { %266 = dma.done.wait [#allocation6], 1024  }
   0xb   :  { %267 = vsyncadd [#allocation6], 4294966272  ;;  %v185_v0 = vld [vmem:[#allocation5 + $0x38] sm:$0xff]  ;;  %v184_v1 = vld [vmem:[#allocation5 + $0x30] sm:$0xff]  ;;  %s274_s24 = smov [#allocation7]   ;;  %s135_s28 = sshll.u32 %s310_s3, 4  ;;  %s136_s28 = int_to_ptr.hbm [resolvable:$true] %s135_s28 }
   0xc   :  { %114 = vmatpush.bf16.msra.mxu0 %v185_v0  ;;  %v183_v2 = vld [vmem:[#allocation5 + $0x28] sm:$0xff]  ;;  %v182_v3 = vld [vmem:[#allocation5 + $0x20] sm:$0xff]  ;;  %v181_v4 = vld [vmem:[#allocation5 + $0x18] sm:$0xff]  ;;  %s133_s25 = sshll.u32 %s274_s24, 4  ;;  %s134_s25 = int_to_ptr.vmem [resolvable:$true] %s133_s25 }
   0xd   :  { %v180_v5 = vld [vmem:[#allocation5 + $0x10] sm:$0xff]  ;;  %v179_v6 = vld [vmem:[#allocation5 + $0x8] sm:$0xff]  ;;  %v178_v7 = vld [vmem:[#allocation5] sm:$0xff] }
   0xe   :  { %v45_v8 = vld [vmem:[#allocation2] sm:$0xf] }
   0xf   :  { %v191_v9 = vld [vmem:[%s309_s2] ss:$0 sm:$0xff] }
  0x10   :  { %115 = vmatpush.bf16.msra.mxu0 %v184_v1 }
  0x14   :  { %116 = vmatpush.bf16.msra.mxu0 %v183_v2 }
  0x18   :  { %117 = vmatpush.bf16.msra.mxu0 %v182_v3 }
  0x1c   :  { %118 = vmatpush.bf16.msra.mxu0 %v181_v4 }
  0x20   :  { %119 = vmatpush.bf16.msra.mxu0 %v180_v5 }
  0x24   :  { %120 = vmatpush.bf16.msra.mxu0 %v179_v6 }
  0x28   :  { %121 = vmatpush.bf16.msra.mxu0 %v178_v7 }
  0x2b   :  { %122 = vmatmul.bf16.vlgmr.msra.gmra.mxu0 %v45_v8 }
  0xa8   :  { %v123_v10 = vpop.f32.mrf.mxu0 }
  0xa9   :  { %v124_v11 = vadd.f32 %v191_v9, %v123_v10 }
  0xab   :  { %127 = vst [vmem:[#allocation7] sm:$0xff] %v124_v11 }
  0xac   :  { %138 = dma.vmem_to_hbm [thread:$0]  %s134_s25, 128, %s136_s28, [#allocation4]  }
  0xb0   :  { %v125_v12 = vpop.f32.mrf.mxu0 }
  0xb1   :  { %268 = dma.done.wait [#allocation4], 128  }
  0xb2   :  { %269 = vsyncadd [#allocation4], 4294967168 }
  0xb3   :  { %143 = vsyncpa [#allocation3], 1 }
  0xb4   :  { %144 = vsyncpa [#allocation6], 1 }
  0xb5   :  { %145 = vsyncpa [#allocation4], 1 }

</bundles_post_ra>
